<compile_context>
chip_gen: v7x
topology: tpu7x:2x2x1
jax: 0.10.0
libtpu: 0.0.40
codegen_flags: <defaults>
</compile_context>

<pallas_src>
import functools

import jax
import jax.numpy as jnp
from jax.experimental import pallas as pl
from jax.experimental.pallas import tpu as pltpu


def _round_up(x, m):
    return (x + m - 1) // m * m


# ----------------------------- fused Pallas kernel -----------------------------

def _mlp_fused_kernel(x_ref, w1_ref, b1_ref, w2_ref, b2_ref, o_ref):
    # fc1: bf16 MXU matmul, f32 accumulation; bias + ReLU in f32.
    xb = x_ref[...].astype(jnp.bfloat16)
    h = jnp.dot(xb, w1_ref[...], preferred_element_type=jnp.float32)
    h = jnp.maximum(h + b1_ref[...], 0.0)
    # TODO(synk): nn.Dropout is identity here (inference / eval mode); train mode
    # would need pltpu.prng_seed / pltpu.prng_random_bits masking.

    # fc2: bf16 MXU matmul, f32 accumulation.  Padded w2 columns are zero and the
    # corresponding b2 entries are -1e30, so padded logits are masked "for free".
    logits = jnp.dot(h.astype(jnp.bfloat16), w2_ref[...],
                     preferred_element_type=jnp.float32)
    logits = logits + b2_ref[...]

    # Row softmax over the 128-wide (lane-dense) logit tile.
    m = jnp.max(logits, axis=-1, keepdims=True)           # XLU row reduce
    e = jnp.exp(logits - m)                                # EUP
    denom = jnp.sum(e, axis=-1, keepdims=True)
    o_ref[...] = e * pl.reciprocal(denom, approx=True)     # EUP vrcp


# ---------------------------------- wrapper ------------------------------------

def _pick_tm(n):
    # n <= 128: single block (block dim == full array dim is legal, no batch pad).
    # 128 < n <= 512: 128-row tiles so the "parallel" axis has >=2 steps (v7x 2 TCs).
    # n > 512: 256-row tiles to fill the 256x256 MXU on v6e/v7x.
    if n <= 128:
        return n
    if n <= 512:
        return 128
    return 256


@functools.partial(jax.jit, static_argnames=("dim_out",))
def mlp_forward(x, params, *, dim_out):
    """x: (N, C, H, W) float32 (PyTorch convention). Returns softmax probs (N, dim_out)."""
    w1, b1, w2, b2 = params["w1"], params["b1"], params["w2"], params["b2"]
    dim_in, dim_hidden = w1.shape
    o_pad = w2.shape[1]

    n = x.shape[0]
    x2 = x.reshape(n, -1).astype(jnp.float32)              # == x.view(-1, C*H*W)
    assert x2.shape[1] == dim_in, (x2.shape, dim_in)

    tm = _pick_tm(n)
    grid = (pl.cdiv(n, tm),)                               # ragged final tile is OK

    out = pl.pallas_call(
        _mlp_fused_kernel,
        out_shape=jax.ShapeDtypeStruct((n, o_pad), jnp.float32),
        grid=grid,
        in_specs=[
            pl.BlockSpec((tm, dim_in), lambda i: (i, 0)),        # activations (tiled on M)
            pl.BlockSpec((dim_in, dim_hidden), lambda i: (0, 0)),  # fc1 weight, bf16, natural shape
            pl.BlockSpec((1, dim_hidden), lambda i: (0, 0)),       # fc1 bias, f32
            pl.BlockSpec((dim_hidden, o_pad), lambda i: (0, 0)),   # fc2 weight, bf16, lane-padded cols
            pl.BlockSpec((1, o_pad), lambda i: (0, 0)),            # fc2 bias, f32, -1e30 in padded cols
        ],
        out_specs=pl.BlockSpec((tm, o_pad), lambda i: (i, 0)),
        compiler_params=pltpu.CompilerParams(
            dimension_semantics=("parallel",),
            vmem_limit_bytes=32 * 1024 * 1024),
    )(x2, w1, b1, w2, b2)

    return out[:, :dim_out]


# --------------------------- deterministic parameters ---------------------------

def init_params(key, dim_in, dim_hidden, dim_out):
    """nn.Linear-style init; weights pre-transposed ((in, out) layout), cast to bf16,
    and the softmax padding mask baked into b2 -- all once, outside the hot path.
    Also returns unpadded f32 PyTorch-layout copies for the reference."""
    def uniform(k, shape, fan_in):
        bound = 1.0 / jnp.sqrt(jnp.float32(fan_in))
        return jax.random.uniform(k, shape, jnp.float32, -bound, bound)

    ks = jax.random.split(key, 4)
    w1_pt = uniform(ks[0], (dim_hidden, dim_in), dim_in)      # PyTorch (out, in)
    b1_pt = uniform(ks[1], (dim_hidden,), dim_in)
    w2_pt = uniform(ks[2], (dim_out, dim_hidden), dim_hidden)
    b2_pt = uniform(ks[3], (dim_out,), dim_hidden)

    o_pad = _round_up(dim_out, 128)

    # fc1: natural (in, hidden) shape, bf16 -> no padding inflation on the dominant DMA.
    w1 = w1_pt.T.astype(jnp.bfloat16)
    b1 = b1_pt.reshape(1, dim_hidden)                         # f32

    # fc2: (hidden, o_pad) bf16 with zero padded columns; bias carries the -1e30 mask
    # for the padded columns so the kernel needs no iota/where.
    w2 = jnp.zeros((dim_hidden, o_pad), jnp.bfloat16)
    w2 = w2.at[:, :dim_out].set(w2_pt.T.astype(jnp.bfloat16))
    b2 = jnp.full((1, o_pad), -1e30, jnp.float32)
    b2 = b2.at[:, :dim_out].set(b2_pt)

    params = {"w1": w1, "b1": b1, "w2": w2, "b2": b2}
    ref = {"w1": w1_pt, "b1": b1_pt, "w2": w2_pt, "b2": b2_pt}
    return params, ref


def mlp_reference(x, ref):
    n = x.shape[0]
    x2 = x.reshape(n, -1)
    h = jnp.maximum(x2 @ ref["w1"].T + ref["b1"], 0.0)        # dropout = identity (eval)
    logits = h @ ref["w2"].T + ref["b2"]
    return jax.nn.softmax(logits, axis=1)


if __name__ == "__main__":
    key = jax.random.PRNGKey(0)
    k_x, k_p = jax.random.split(key)

    # Small shapes implied by forward(): x is (N, C, H, W) flattened to (N, C*H*W).
    N, C, H, W = 2, 4, 16, 16
    dim_in, dim_hidden, dim_out = C * H * W, 32, 10

    x = jax.random.normal(k_x, (N, C, H, W), jnp.float32)
    params, ref_params = init_params(k_p, dim_in, dim_hidden, dim_out)

    probs = mlp_forward(x, params, dim_out=dim_out)
    probs = jax.block_until_ready(probs)

    assert probs.shape == (N, dim_out), probs.shape
    expected = mlp_reference(x, ref_params)
    # Tolerances loosened for bf16 matmul inputs + EUP approx reciprocal.
    assert bool(jnp.allclose(probs, expected, atol=2e-2, rtol=2e-2)), (probs, expected)
    row_sums = probs.sum(axis=1)
    assert bool(jnp.all(jnp.abs(row_sums - 1.0) < 2e-3)), row_sums
    print("KERNEL_OK")
</pallas_src>

<mosaic_0001>
module attributes {stable_mosaic.version = 11 : i64} {
  func.func @_mlp_fused_kernel(%arg0: i32, %arg1: memref<2x1024xf32, #tpu.memory_space<vmem>>, %arg2: memref<1024x32xbf16, #tpu.memory_space<vmem>>, %arg3: memref<1x32xf32, #tpu.memory_space<vmem>>, %arg4: memref<32x128xbf16, #tpu.memory_space<vmem>>, %arg5: memref<1x128xf32, #tpu.memory_space<vmem>>, %arg6: memref<2x128xf32, #tpu.memory_space<vmem>>) attributes {dimension_semantics = [#tpu.dimension_semantics<parallel>], iteration_bounds = array<i64: 1>, scalar_prefetch = 0 : i64, scratch_operands = 0 : i64, tpu.core_type = #tpu.core_type<tc>, window_params = [{transform_indices = @transform_0, window_bounds = array<i64: 2, 1024>}, {pipeline_mode = #tpu.pipeline_mode<synchronous>, transform_indices = @transform_1, window_bounds = array<i64: 1024, 32>}, {pipeline_mode = #tpu.pipeline_mode<synchronous>, transform_indices = @transform_2, window_bounds = array<i64: 1, 32>}, {pipeline_mode = #tpu.pipeline_mode<synchronous>, transform_indices = @transform_3, window_bounds = array<i64: 32, 128>}, {pipeline_mode = #tpu.pipeline_mode<synchronous>, transform_indices = @transform_4, window_bounds = array<i64: 1, 128>}, {transform_indices = @transform_5, window_bounds = array<i64: 2, 128>}]} {
    %c0 = arith.constant 0 : index
    %c0_0 = arith.constant 0 : index
    %0 = vector.load %arg1[%c0, %c0_0] : memref<2x1024xf32, #tpu.memory_space<vmem>>, vector<2x1024xf32>
    %1 = arith.truncf %0 : vector<2x1024xf32> to vector<2x1024xbf16>
    %c0_1 = arith.constant 0 : index
    %c0_2 = arith.constant 0 : index
    %2 = vector.load %arg2[%c0_1, %c0_2] : memref<1024x32xbf16, #tpu.memory_space<vmem>>, vector<1024x32xbf16>
    %cst = arith.constant dense<0.000000e+00> : vector<2x32xf32>
    %3 = tpu.matmul %1, %2, %cst {dimension_numbers = #tpu.dot_dimension_numbers<[1], [0], [0], [1], [0, 0, 1, 1], [], []>} : vector<2x1024xbf16>, vector<1024x32xbf16>, vector<2x32xf32> -> vector<2x32xf32>
    %c0_3 = arith.constant 0 : index
    %c0_4 = arith.constant 0 : index
    %4 = vector.load %arg3[%c0_3, %c0_4] : memref<1x32xf32, #tpu.memory_space<vmem>>, vector<1x32xf32>
    %5 = vector.broadcast %4 : vector<1x32xf32> to vector<2x32xf32>
    %6 = arith.addf %3, %5 : vector<2x32xf32>
    %cst_5 = arith.constant 0.000000e+00 : f32
    %7 = vector.broadcast %cst_5 : f32 to vector<2x32xf32>
    %8 = arith.maximumf %6, %7 : vector<2x32xf32>
    %9 = arith.truncf %8 : vector<2x32xf32> to vector<2x32xbf16>
    %c0_6 = arith.constant 0 : index
    %c0_7 = arith.constant 0 : index
    %10 = vector.load %arg4[%c0_6, %c0_7] : memref<32x128xbf16, #tpu.memory_space<vmem>>, vector<32x128xbf16>
    %cst_8 = arith.constant dense<0.000000e+00> : vector<2x128xf32>
    %11 = tpu.matmul %9, %10, %cst_8 {dimension_numbers = #tpu.dot_dimension_numbers<[1], [0], [0], [1], [0, 0, 1, 1], [], []>} : vector<2x32xbf16>, vector<32x128xbf16>, vector<2x128xf32> -> vector<2x128xf32>
    %c0_9 = arith.constant 0 : index
    %c0_10 = arith.constant 0 : index
    %12 = vector.load %arg5[%c0_9, %c0_10] : memref<1x128xf32, #tpu.memory_space<vmem>>, vector<1x128xf32>
    %13 = vector.broadcast %12 : vector<1x128xf32> to vector<2x128xf32>
    %14 = arith.addf %11, %13 : vector<2x128xf32>
    %cst_11 = arith.constant dense<0xFF800000> : vector<2xf32>
    %15 = vector.multi_reduction <maximumf>, %14, %cst_11 [1] : vector<2x128xf32> to vector<2xf32>
    %16 = vector.shape_cast %15 : vector<2xf32> to vector<2x1xf32>
    %17 = vector.broadcast %16 : vector<2x1xf32> to vector<2x128xf32>
    %18 = arith.subf %14, %17 : vector<2x128xf32>
    %19 = math.exp %18 : vector<2x128xf32>
    %cst_12 = arith.constant dense<0.000000e+00> : vector<2xf32>
    %20 = vector.multi_reduction <add>, %19, %cst_12 [1] : vector<2x128xf32> to vector<2xf32>
    %21 = vector.shape_cast %20 : vector<2xf32> to vector<2x1xf32>
    %22 = tpu.reciprocal %21 {approx = true} : vector<2x1xf32> -> vector<2x1xf32>
    %23 = vector.broadcast %22 : vector<2x1xf32> to vector<2x128xf32>
    %24 = arith.mulf %19, %23 : vector<2x128xf32>
    %c0_13 = arith.constant 0 : index
    %c0_14 = arith.constant 0 : index
    %25 = vector.load %arg6[%c0_13, %c0_14] : memref<2x128xf32, #tpu.memory_space<vmem>>, vector<2x128xf32>
    tpu.vector_store %arg6[%c0_13, %c0_14], %24 {strides = array<i32>} : memref<2x128xf32, #tpu.memory_space<vmem>>, vector<2x128xf32>,
    return
  }
  func.func @transform_0(%arg0: i32) -> (i32, i32) {
    %c0_i32 = arith.constant 0 : i32
    %c0_i32_0 = arith.constant 0 : i32
    return %arg0, %c0_i32 : i32, i32
  }
  func.func @transform_1(%arg0: i32) -> (i32, i32) {
    %c0_i32 = arith.constant 0 : i32
    %c0_i32_0 = arith.constant 0 : i32
    %c0_i32_1 = arith.constant 0 : i32
    return %c0_i32, %c0_i32_0 : i32, i32
  }
  func.func @transform_2(%arg0: i32) -> (i32, i32) {
    %c0_i32 = arith.constant 0 : i32
    %c0_i32_0 = arith.constant 0 : i32
    %c0_i32_1 = arith.constant 0 : i32
    return %c0_i32, %c0_i32_0 : i32, i32
  }
  func.func @transform_3(%arg0: i32) -> (i32, i32) {
    %c0_i32 = arith.constant 0 : i32
    %c0_i32_0 = arith.constant 0 : i32
    %c0_i32_1 = arith.constant 0 : i32
    return %c0_i32, %c0_i32_0 : i32, i32
  }
  func.func @transform_4(%arg0: i32) -> (i32, i32) {
    %c0_i32 = arith.constant 0 : i32
    %c0_i32_0 = arith.constant 0 : i32
    %c0_i32_1 = arith.constant 0 : i32
    return %c0_i32, %c0_i32_0 : i32, i32
  }
  func.func @transform_5(%arg0: i32) -> (i32, i32) {
    %c0_i32 = arith.constant 0 : i32
    %c0_i32_0 = arith.constant 0 : i32
    return %arg0, %c0_i32 : i32, i32
  }
}

</mosaic_0001>

<bundles_post_ra>
// kernel: mlp_forward.1
= control target key start
LH: loop header
LB: loop body
LE: loop exit
PB: predicated region body
PF: predicated region fallthrough
CT: control target
= control target key end

     0   :  { %v30_v28 = vlaneseq  ;;  %v1119_v36 = vmov 1983009808   ;;  %s1381_s0 = inlined_call_operand.vmem [shape: f32[2,1024], index: 0, kind: input, shape index: {}]   ;;  %s1382_s1 = inlined_call_operand.vmem [shape: bf16[1024,32], index: 1, kind: input, shape index: {}]   ;;  %s1383_s2 = inlined_call_operand.vmem [shape: f32[1,32], index: 2, kind: input, shape index: {}]   ;;  %s1384_s3 = inlined_call_operand.vmem [shape: bf16[32,128], index: 3, kind: input, shape index: {}]   ;;  %s1385_s4 = inlined_call_operand.vmem [shape: f32[1,128], index: 4, kind: input, shape index: {}]   ;;  %s1386_s5 = inlined_call_operand.hbm [shape: f32[2,128], index: 5, kind: output, shape index: {}]  }
   0x1   :  { %v1023_v0 = vld [vmem:[%s1382_s1 + $0x40] sm:$0xff]   ;;  %v1027_v4 = vld [vmem:[%s1382_s1 + $0x48] sm:$0xff]   ;;  %v1031_v8 = vld [vmem:[%s1382_s1 + $0x50] sm:$0xff]   ;;  %v28_v37 = vunpack.c.l.s4 %v1119_v36 }
   0x2   :  { %v1024_v1 = vld [vmem:[%s1382_s1 + $0xc0] sm:$0xff]   ;;  %920 = vmatprep.subr.bf16.mxu0 %v1023_v0  ;;  %v1028_v5 = vld [vmem:[%s1382_s1 + $0xc8] sm:$0xff]   ;;  %v1032_v9 = vld [vmem:[%s1382_s1 + $0xd0] sm:$0xff]   ;;  %v31_v33 = vshrl.u32 %v30_v28, 7 }
   0x3   :  { %v1025_v2 = vld [vmem:[%s1382_s1] sm:$0xff]   ;;  %942 = vmatprep.subr.bf16.mxu1 %v1024_v1  ;;  %v1029_v6 = vld [vmem:[%s1382_s1 + $0x8] sm:$0xff]   ;;  %v1033_v10 = vld [vmem:[%s1382_s1 + $0x10] sm:$0xff]   ;;  %v29_v39 = vunpack.c.0.s8 %v28_v37 }
   0x4   :  { %v1026_v3 = vld [vmem:[%s1382_s1 + $0x80] sm:$0xff]   ;;  %921 = vmatpush3.bf16.msra.mxu0 %v1025_v2  ;;  %v1030_v7 = vld [vmem:[%s1382_s1 + $0x88] sm:$0xff]   ;;  %v1034_v11 = vld [vmem:[%s1382_s1 + $0x90] sm:$0xff]  }
   0x5   :  { %943 = vmatpush3.bf16.msra.mxu1 %v1026_v3  ;;  %922 = vmatprep.subr.bf16.mxu0 %v1027_v4  ;;  %v1035_v12 = vld [vmem:[%s1382_s1 + $0x58] sm:$0xff]   ;;  %v1039_v16 = vld [vmem:[%s1382_s1 + $0x60] sm:$0xff]   ;;  %v1043_v20 = vld [vmem:[%s1382_s1 + $0x68] sm:$0xff]   ;;  %v1258_v41 = vsub.s32 %v29_v39, %v31_v33 }
   0x6   :  { %944 = vmatprep.subr.bf16.mxu1 %v1028_v5  ;;  %v1036_v13 = vld [vmem:[%s1382_s1 + $0xd8] sm:$0xff]   ;;  %v1040_v17 = vld [vmem:[%s1382_s1 + $0xe0] sm:$0xff]   ;;  %v1044_v21 = vld [vmem:[%s1382_s1 + $0xe8] sm:$0xff]  }
   0x7   :  { %v1037_v14 = vld [vmem:[%s1382_s1 + $0x18] sm:$0xff]   ;;  %v1041_v18 = vld [vmem:[%s1382_s1 + $0x20] sm:$0xff]   ;;  %v1045_v22 = vld [vmem:[%s1382_s1 + $0x28] sm:$0xff]  }
   0x8   :  { %923 = vmatpush3.bf16.msra.mxu0 %v1029_v6  ;;  %v1038_v15 = vld [vmem:[%s1382_s1 + $0x98] sm:$0xff]   ;;  %v1042_v19 = vld [vmem:[%s1382_s1 + $0xa0] sm:$0xff]   ;;  %v1046_v23 = vld [vmem:[%s1382_s1 + $0xa8] sm:$0xff]  }
   0x9   :  { %945 = vmatpush3.bf16.msra.mxu1 %v1030_v7  ;;  %924 = vmatprep.subr.bf16.mxu0 %v1031_v8  ;;  %v1047_v24 = vld [vmem:[%s1382_s1 + $0x70] sm:$0xff]   ;;  %v1051_v29 = vld [vmem:[%s1382_s1 + $0x78] sm:$0xff]   ;;  %v22_v34 = vld [vmem:[%s1381_s0] sm:$0xff] }
   0xa   :  { %946 = vmatprep.subr.bf16.mxu1 %v1032_v9  ;;  %v1048_v25 = vld [vmem:[%s1382_s1 + $0xf0] sm:$0xff]   ;;  %v1052_v30 = vld [vmem:[%s1382_s1 + $0xf8] sm:$0xff]   ;;  %v1056_v35 = vld [vmem:[%s1382_s1 + $0x140] sm:$0xff]   ;;  %v26_v40 = vcombine.high %v22_v34, %v22_v34  ;;  %v33_v42 = vrot.slane %v22_v34, %v1258_v41 }
   0xb   :  { %v1049_v26 = vld [vmem:[%s1382_s1 + $0x30] sm:$0xff]   ;;  %v1053_v31 = vld [vmem:[%s1382_s1 + $0x38] sm:$0xff]   ;;  %v1057_v38 = vld [vmem:[%s1382_s1 + $0x1c0] sm:$0xff]  }
   0xc   :  { %925 = vmatpush3.bf16.msra.mxu0 %v1033_v10  ;;  %v1050_v27 = vld [vmem:[%s1382_s1 + $0xb0] sm:$0xff]   ;;  %v1054_v32 = vld [vmem:[%s1382_s1 + $0xb8] sm:$0xff]   ;;  %v40_v43 = vrot.slane %v26_v40, %v1258_v41  ;;  %v41_v44 = vcombine.high %v33_v42, %v33_v42  ;;  %v1058_v46 = vld [vmem:[%s1382_s1 + $0x100] sm:$0xff]   ;;  %v68_v47 = vpack.c.bf16 %v33_v42, %v33_v42 }
   0xd   :  { %947 = vmatpush3.bf16.msra.mxu1 %v1034_v11  ;;  %926 = vmatprep.subr.bf16.mxu0 %v1035_v12  ;;  %v1059_v49 = vld [vmem:[%s1382_s1 + $0x180] sm:$0xff]   ;;  %v1060_v52 = vld [vmem:[%s1382_s1 + $0x148] sm:$0xff]   ;;  %v1064_v56 = vld [vmem:[%s1382_s1 + $0x150] sm:$0xff]  }
   0xe   :  { %948 = vmatprep.subr.bf16.mxu1 %v1036_v13  ;;  %v42_v45 = vcombine.high %v40_v43, %v40_v43  ;;  %v70_v48 = vpack.c.bf16 %v40_v43, %v40_v43  ;;  %v69_v50 = vpack.c.bf16 %v41_v44, %v41_v44  ;;  %v1061_v53 = vld [vmem:[%s1382_s1 + $0x1c8] sm:$0xff]   ;;  %v1065_v57 = vld [vmem:[%s1382_s1 + $0x1d0] sm:$0xff]   ;;  %v1068_v60 = vld [vmem:[%s1382_s1 + $0x158] sm:$0xff]  }
   0xf   :  { %v1062_v54 = vld [vmem:[%s1382_s1 + $0x108] sm:$0xff]   ;;  %v1066_v58 = vld [vmem:[%s1382_s1 + $0x110] sm:$0xff]   ;;  %v1069_v61 = vld [vmem:[%s1382_s1 + $0x1d8] sm:$0xff]  }
  0x10   :  { %927 = vmatpush3.bf16.msra.mxu0 %v1037_v14  ;;  %v71_v51 = vpack.c.bf16 %v42_v45, %v42_v45  ;;  %627 = vmatprep.mubr.bf16.mxu0 %v69_v50  ;;  %v1063_v55 = vld [vmem:[%s1382_s1 + $0x188] sm:$0xff]   ;;  %v1067_v59 = vld [vmem:[%s1382_s1 + $0x190] sm:$0xff]   ;;  %v1070_v62 = vld [vmem:[%s1382_s1 + $0x118] sm:$0xff]  }
  0x11   :  { %949 = vmatpush3.bf16.msra.mxu1 %v1038_v15  ;;  %928 = vmatprep.subr.bf16.mxu0 %v1039_v16  ;;  %v1071_v63 = vld [vmem:[%s1382_s1 + $0x198] sm:$0xff]   ;;  %v1072_v0 = vld [vmem:[%s1382_s1 + $0x160] sm:$0xff]   ;;  %v1076_v4 = vld [vmem:[%s1382_s1 + $0x168] sm:$0xff]  }
  0x12   :  { %950 = vmatprep.subr.bf16.mxu1 %v1040_v17  ;;  %667 = vmatprep.mubr.bf16.mxu1 %v71_v51  ;;  %v1073_v1 = vld [vmem:[%s1382_s1 + $0x1e0] sm:$0xff]   ;;  %v1077_v5 = vld [vmem:[%s1382_s1 + $0x1e8] sm:$0xff]   ;;  %v1080_v8 = vld [vmem:[%s1382_s1 + $0x170] sm:$0xff]  }
  0x13   :  { %v1074_v2 = vld [vmem:[%s1382_s1 + $0x120] sm:$0xff]   ;;  %v1078_v6 = vld [vmem:[%s1382_s1 + $0x128] sm:$0xff]   ;;  %v1081_v9 = vld [vmem:[%s1382_s1 + $0x1f0] sm:$0xff]  }
  0x14   :  { %929 = vmatpush3.bf16.msra.mxu0 %v1041_v18  ;;  %v1075_v3 = vld [vmem:[%s1382_s1 + $0x1a0] sm:$0xff]   ;;  %v1079_v7 = vld [vmem:[%s1382_s1 + $0x1a8] sm:$0xff]  }
  0x15   :  { %951 = vmatpush3.bf16.msra.mxu1 %v1042_v19  ;;  %930 = vmatprep.subr.bf16.mxu0 %v1043_v20  ;;  %v23_v10 = vld [vmem:[%s1381_s0 + $0x8] sm:$0xff] }
  0x16   :  { %952 = vmatprep.subr.bf16.mxu1 %v1044_v21  ;;  %v50_v11 = vrot.slane %v23_v10, %v1258_v41  ;;  %v43_v12 = vcombine.high %v23_v10, %v23_v10 }
  0x18   :  { %931 = vmatpush3.bf16.msra.mxu0 %v1045_v22 }
  0x19   :  { %953 = vmatpush3.bf16.msra.mxu1 %v1046_v23  ;;  %932 = vmatprep.subr.bf16.mxu0 %v1047_v24 }
  0x1a   :  { %954 = vmatprep.subr.bf16.mxu1 %v1048_v25 }
  0x1c   :  { %933 = vmatpush3.bf16.msra.mxu0 %v1049_v26 }
  0x1d   :  { %955 = vmatpush3.bf16.msra.mxu1 %v1050_v27  ;;  %934 = vmatprep.subr.bf16.mxu0 %v1051_v29 }
  0x1e   :  { %956 = vmatprep.subr.bf16.mxu1 %v1052_v30 }
  0x20   :  { %935 = vmatpush3.bf16.msra.mxu0 %v1053_v31 }
  0x21   :  { %957 = vmatpush3.bf16.msra.mxu1 %v1054_v32  ;;  %964 = vmatprep.subr.bf16.mxu0 %v1056_v35 }
  0x22   :  { %986 = vmatprep.subr.bf16.mxu1 %v1057_v38 }
  0x23   :  { %628 = vmatmul.mubr.bf16.vlgmr.msra.gmra.mrb[0].mxu0 %v68_v47 }
  0x24   :  { %668 = vmatmul.mubr.bf16.vlgmr.msra.gmra.mrb[0].mxu1 %v70_v48  ;;  %965 = vmatpush3.bf16.msra.mxu0 %v1058_v46 }
  0x25   :  { %987 = vmatpush3.bf16.msra.mxu1 %v1059_v49  ;;  %966 = vmatprep.subr.bf16.mxu0 %v1060_v52 }
  0x26   :  { %988 = vmatprep.subr.bf16.mxu1 %v1061_v53 }
  0x28   :  { %967 = vmatpush3.bf16.msra.mxu0 %v1062_v54 }
  0x29   :  { %989 = vmatpush3.bf16.msra.mxu1 %v1063_v55  ;;  %968 = vmatprep.subr.bf16.mxu0 %v1064_v56 }
  0x2a   :  { %990 = vmatprep.subr.bf16.mxu1 %v1065_v57 }
  0x2c   :  { %969 = vmatpush3.bf16.msra.mxu0 %v1066_v58 }
  0x2d   :  { %991 = vmatpush3.bf16.msra.mxu1 %v1067_v59  ;;  %970 = vmatprep.subr.bf16.mxu0 %v1068_v60 }
  0x2e   :  { %992 = vmatprep.subr.bf16.mxu1 %v1069_v61 }
  0x30   :  { %971 = vmatpush3.bf16.msra.mxu0 %v1070_v62 }
  0x31   :  { %993 = vmatpush3.bf16.msra.mxu1 %v1071_v63  ;;  %972 = vmatprep.subr.bf16.mxu0 %v1072_v0 }
  0x32   :  { %994 = vmatprep.subr.bf16.mxu1 %v1073_v1 }
  0x34   :  { %973 = vmatpush3.bf16.msra.mxu0 %v1074_v2 }
  0x35   :  { %995 = vmatpush3.bf16.msra.mxu1 %v1075_v3  ;;  %974 = vmatprep.subr.bf16.mxu0 %v1076_v4 }
  0x36   :  { %996 = vmatprep.subr.bf16.mxu1 %v1077_v5 }
  0x37   :  { %10 = vsyncpa [#allocation3], 0  ;;  %v1082_v13 = vld [vmem:[%s1382_s1 + $0x130] sm:$0xff]   ;;  %v58_v15 = vcombine.high %v50_v11, %v50_v11  ;;  %v57_v16 = vrot.slane %v43_v12, %v1258_v41  ;;  %v1084_v17 = vld [vmem:[%s1382_s1 + $0x178] sm:$0xff]   ;;  %v72_v24 = vpack.c.bf16 %v50_v11, %v50_v11  ;;  %v1120_v27 = vmov 0.0   ;;  %s1122_s29 = smov [#allocation2]  }
  0x38   :  { %975 = vmatpush3.bf16.msra.mxu0 %v1078_v6  ;;  %v1083_v14 = vld [vmem:[%s1382_s1 + $0x1b0] sm:$0xff]   ;;  %v1085_v18 = vld [vmem:[%s1382_s1 + $0x1f8] sm:$0xff]   ;;  %v1089_v26 = vld [vmem:[%s1384_s3] sm:$0xff]   ;;  %vm1121_vm0 = vmmov 0   ;;  %vm780_vm1 = vcmask 261120   ;;  %vm824_vm2 = vcmask 1041408  }
  0x39   :  { %997 = vmatpush3.bf16.msra.mxu1 %v1079_v7  ;;  %976 = vmatprep.subr.bf16.mxu0 %v1080_v8  ;;  %v73_v19 = vpack.c.bf16 %v58_v15, %v58_v15  ;;  %v59_v20 = vcombine.high %v57_v16, %v57_v16  ;;  %v1086_v21 = vld [vmem:[%s1382_s1 + $0x138] sm:$0xff]   ;;  %v74_v25 = vpack.c.bf16 %v57_v16, %v57_v16  ;;  %v1090_v28 = vld [vmem:[%s1384_s3 + $0x8] sm:$0xff]   ;;  %v851_v31 = vld [vmem:[%s1383_s2] ss:$0 sm:$0xff]  ;;  %s843_s30 = sshll.u32 %s1122_s29, 4  ;;  %s844_s30 = int_to_ptr.vmem [resolvable:$true] %s843_s30 }
  0x3a   :  { %998 = vmatprep.subr.bf16.mxu1 %v1081_v9  ;;  %v1087_v22 = vld [vmem:[%s1382_s1 + $0x1b8] sm:$0xff]   ;;  %v916_v56 = vld [vmem:[%s1385_s4] ss:$0 sm:$0xff]  ;;  %s1095_s4 = scalar_lea.vmem %s844_s30, 32  ;;  %p1100_p1 = scmp.lt.s32.totalorder %s844_s30, %s844_s30 }
  0x3b   :  { %v75_v23 = vpack.c.bf16 %v59_v20, %v59_v20  ;;  %707 = vmatprep.mubr.bf16.mxu0 %v73_v19  ;;  %p1096_p0 = scmp.ne.s32.totalorder %s844_s30, %s1095_s4  ;;  %p1101_p2 = scmp.lt.s32.totalorder %s1095_s4, %s1095_s4 }
  0x3c   :  { %977 = vmatpush3.bf16.msra.mxu0 %v1082_v13 }
  0x3d   :  { %999 = vmatpush3.bf16.msra.mxu1 %v1083_v14  ;;  %978 = vmatprep.subr.bf16.mxu0 %v1084_v17  ;;  %p1102_p3 = por %p1101_p2, %p1100_p1 }
  0x3e   :  { %1000 = vmatprep.subr.bf16.mxu1 %v1085_v18  ;;  %747 = vmatprep.mubr.bf16.mxu1 %v75_v23 }
  0x3f   :  { %p1103_p4 = pnand %p1102_p3, %p1096_p0 }
  0x40   :  { %979 = vmatpush3.bf16.msra.mxu0 %v1086_v21 }
  0x41   :  { %1001 = vmatpush3.bf16.msra.mxu1 %v1087_v22  ;;  %1011 = vmatprep.subr.bf16.mxu0 %v1120_v27 }
  0x43   :  { %708 = vmatmul.mubr.bf16.vlgmr.msra.gmra.mrb[4].mxu0 %v72_v24 }
  0x44   :  { %748 = vmatmul.mubr.bf16.vlgmr.msra.gmra.mrb[4].mxu1 %v74_v25  ;;  %1012 = vmatpush3.bf16.msra.mxu0 %v1089_v26 }
  0x45   :  { %1013 = vmatprep.subr.bf16.mxu0 %v1120_v27  ;;  %1015 = vmatprep.mubr.msk.bf16.mxu0 %vm1121_vm0, %v1120_v27 }
  0x48   :  { %1014 = vmatpush3.bf16.msra.mxu0 %v1090_v28 }
  0xf6   :  { %v936_v29 = vpop.f32.mrb[0].mxu0 }
  0xf7   :  { %v958_v30 = vpop.f32.mrb[0].mxu1  ;;  %v937_v32 = vpop.f32.mrb[1].mxu0 }
  0xf8   :  { %v959_v33 = vpop.f32.mrb[1].mxu1  ;;  %v938_v34 = vadd.f32 %v937_v32, %v936_v29  ;;  %v939_v36 = vpop.f32.mrb[2].mxu0 }
  0xf9   :  { %v960_v35 = vadd.f32 %v959_v33, %v958_v30  ;;  %v961_v37 = vpop.f32.mrb[2].mxu1  ;;  %v940_v38 = vpop.f32.mrb[3].mxu0 }
  0xfa   :  { %v962_v39 = vpop.f32.mrb[3].mxu1  ;;  %v630_v40 = vadd.f32 %v938_v34, %v851_v31 }
  0xfc   :  { %v670_v41 = vadd.f32 %v960_v35, %v630_v40 }
 0x116   :  { %v980_v42 = vpop.f32.mrb[4].mxu0 }
 0x117   :  { %v1002_v43 = vpop.f32.mrb[4].mxu1  ;;  %v981_v44 = vpop.f32.mrb[5].mxu0 }
 0x118   :  { %v1003_v45 = vpop.f32.mrb[5].mxu1  ;;  %v982_v46 = vadd.f32 %v981_v44, %v980_v42  ;;  %v983_v48 = vpop.f32.mrb[6].mxu0 }
 0x119   :  { %v1004_v47 = vadd.f32 %v1003_v45, %v1002_v43  ;;  %v1005_v49 = vpop.f32.mrb[6].mxu1  ;;  %v984_v50 = vpop.f32.mrb[7].mxu0 }
 0x11a   :  { %v1006_v51 = vpop.f32.mrb[7].mxu1  ;;  %v710_v52 = vadd.f32 %v982_v46, %v670_v41 }
 0x11c   :  { %v750_v53 = vadd.f32 %v1004_v47, %v710_v52 }
 0x11e   :  { %v755_v54 = vmax.f32 %v750_v53, 0.0 }
 0x120   :  { %v756_v55 = vpack.c.bf16 %v755_v54, %v755_v54 }
 0x122   :  { %1016 = vmatmul.mubr.msk.bf16.vlgmr.msra.gmra.mrb[8].mxu0 %vm780_vm1, %v756_v55 }
 0x1f5   :  { %v818_v57 = vpop.f32.mrb[8].mxu0 }
 0x1f6   :  { %v819_v58 = vadd.f32 %v916_v56, %v818_v57  ;;  %v1017_v59 = vpop.f32.mrb[9].mxu0 }
 0x1f7   :  { %v821_v60 = vpop.f32.mrb[10].mxu0 }
 0x1f8   :  { %v1018_v61 = vpop.f32.mrb[11].mxu0  ;;  %v825_v62 = vsel %vm824_vm2, %v819_v58, -inf }
 0x1f9   :  { %826 = vmax.xlane.f32.xlu0 %v825_v62 }
 0x286   :  { %v827_v63 = vpop.xlane.xlu0 %826 }
 0x287   :  { %v828_v0 = vsub.f32 %v819_v58, %v827_v63 }
 0x289   :  { %v829_v1 = vmul.f32 1.442695, %v828_v0 }
 0x28b   :  { %1091 = vpow2.f32 %v829_v1 }
 0x295   :  { %v1092_v2 = vpop.eup %1091 }
 0x296   :  { %v831_v3 = vsel %vm824_vm2, %v1092_v2, 0.0 }
 0x297   :  { %832 = vadd.xlane.f32.xlu0 %v831_v3 }
 0x324   :  { %v833_v4 = vpop.xlane.xlu0 %832 }
 0x325   :  { %1093 = vrcp.f32 %v833_v4 }
 0x32f   :  { %v1094_v5 = vpop.eup %1093 }
 0x330   :  { %v835_v6 = vmul.f32 %v1094_v5, %v1092_v2 }
 0x332   :  { %836 = vst [vmem:[#allocation2] sm:$0x3] %v835_v6 }
 0x333   :  { %1106 = shalt.err (!%p1103_p4)
}
 0x334   :  { %s1107_s8 = scalar_lea.hbm %s1386_s5, 32 }
 0x335   :  { %p1108_p5 = scmp.ne.s32.totalorder %s1386_s5, %s1107_s8  ;;  %p1111_p6 = scmp.lt.u32.totalorder %s1107_s8, %s1386_s5 }
 0x337   :  { %p1113_p7 = pnand %p1111_p6, %p1108_p5 }
 0x339   :  { %1116 = shalt.err (!%p1113_p7)
}
 0x33a   :  { %846 = dma.vmem_to_hbm [thread:$0]  %s844_s30, 32, %s1386_s5, [#allocation3]  }
 0x33b   :  { %1117 = dma.done.wait [#allocation3], 32  }
 0x33c   :  { %1118 = vsyncadd [#allocation3], 4294967264 }
 0x33d   :  { %850 = vsyncpa [#allocation3], 1 }

</bundles_post_ra>
